<compile_context>
chip_gen: v6e
topology: v6e:2x2x1
jax: 0.10.0
libtpu: 0.0.40
codegen_flags: <defaults>
</compile_context>

<pallas_src>
import functools

import jax
import jax.numpy as jnp
from jax.experimental import pallas as pl
from jax.experimental.pallas import tpu as pltpu


def _dma_copy_kernel(row_splits, x_hbm, o_hbm, sems):
    """Copy the whole (rows, cols) slab HBM->HBM with a few concurrent DMAs.

    `row_splits` is a static Python tuple of (start_row, num_rows) chunks that
    exactly cover the row dimension, so the DMAs write disjoint regions of the
    output. Start them all, then wait for all.
    """
    copies = []
    for k, (start, size) in enumerate(row_splits):
        cp = pltpu.make_async_copy(
            x_hbm.at[pl.ds(start, size), :],
            o_hbm.at[pl.ds(start, size), :],
            sems.at[k],
        )
        cp.start()
        copies.append(cp)
    for cp in copies:
        cp.wait()


def _row_splits(rows, max_chunks=4):
    """Split `rows` into up to `max_chunks` contiguous, near-equal chunks."""
    n = max(1, min(rows, max_chunks))
    base, rem = divmod(rows, n)
    splits, start = [], 0
    for k in range(n):
        size = base + (1 if k < rem else 0)
        if size > 0:
            splits.append((start, size))
        start += size
    return tuple(splits)


def _flat_shape(x):
    b = x.shape[0]
    feat = 1
    for d in x.shape[1:]:
        feat *= d
    return b, feat


def view_flatten(x):
    """PyTorch `View.forward`: x.view(-1, numel // B).

    Metadata-only reshape of a contiguous buffer — no kernel, no HBM traffic.
    """
    b, feat = _flat_shape(x)
    return x.reshape(b, feat)


@jax.jit
def view_flatten_materialized(x):
    """Same semantics, but materializes a fresh (B, F) buffer via a Pallas
    HBM->HBM DMA copy (no VMEM staging, no input donation)."""
    b, feat = _flat_shape(x)
    x_flat = x.reshape(b, feat)  # metadata-only row-major flatten (torch.view order)

    splits = _row_splits(b)
    itemsize = jnp.dtype(x.dtype).itemsize
    nbytes = b * feat * itemsize

    return pl.pallas_call(
        functools.partial(_dma_copy_kernel, splits),
        out_shape=jax.ShapeDtypeStruct((b, feat), x.dtype),
        in_specs=[pl.BlockSpec(memory_space=pl.ANY)],
        out_specs=pl.BlockSpec(memory_space=pl.ANY),
        scratch_shapes=[pltpu.SemaphoreType.DMA((len(splits),))],
        # Pure memory-bound custom call: read + write of numel*itemsize bytes.
        cost_estimate=pl.CostEstimate(
            flops=0, transcendentals=0, bytes_accessed=2 * nbytes
        ),
    )(x_flat)


if __name__ == "__main__":
    key = jax.random.PRNGKey(0)
    # NCHW input, small shapes: batch=2, channels=4, spatial=16x16
    x = jax.random.normal(key, (2, 4, 16, 16), dtype=jnp.float32)

    # The actual View.forward (what the module does): metadata-only.
    y_view = view_flatten(x)

    # Pallas materialization path (fresh buffer), run once and blocked on.
    y_kernel = view_flatten_materialized(x)
    jax.block_until_ready(y_kernel)

    expected = x.reshape(x.shape[0], -1)
    assert y_view.shape == (2, 4 * 16 * 16), y_view.shape
    assert y_kernel.shape == (2, 4 * 16 * 16), y_kernel.shape
    assert jnp.array_equal(y_view, expected)
    assert jnp.array_equal(y_kernel, expected)

    print("KERNEL_OK")
</pallas_src>

<mosaic_0001>
module attributes {stable_mosaic.version = 11 : i64} {
  func.func @_dma_copy_kernel(%arg0: memref<2x1024xf32, #tpu.memory_space<any>>, %arg1: memref<2x1024xf32, #tpu.memory_space<any>>, %arg2: memref<2x!tpu.dma_semaphore, #tpu.memory_space<semaphore_mem>>) attributes {dimension_semantics = [], scalar_prefetch = 0 : i64, scratch_operands = 1 : i64, tpu.core_type = #tpu.core_type<tc>} {
    %c0_i32 = arith.constant 0 : i32
    %c0_i32_0 = arith.constant 0 : i32
    %c0_i32_1 = arith.constant 0 : i32
    %0 = tpu.memref_slice %arg0[%c0_i32_0, %c0_i32_1] : memref<2x1024xf32, #tpu.memory_space<any>> -> memref<1x1024xf32, #tpu.memory_space<any>>
    %c0_i32_2 = arith.constant 0 : i32
    %c0_i32_3 = arith.constant 0 : i32
    %1 = tpu.memref_slice %arg1[%c0_i32_2, %c0_i32_3] : memref<2x1024xf32, #tpu.memory_space<any>> -> memref<1x1024xf32, #tpu.memory_space<any>>
    %2 = tpu.memref_slice %arg2[%c0_i32] : memref<2x!tpu.dma_semaphore, #tpu.memory_space<semaphore_mem>> -> memref<1x!tpu.dma_semaphore, #tpu.memory_space<semaphore_mem>>
    %3 = tpu.memref_squeeze %2 : memref<1x!tpu.dma_semaphore, #tpu.memory_space<semaphore_mem>> -> memref<!tpu.dma_semaphore, #tpu.memory_space<semaphore_mem>>
    tpu.enqueue_dma source(%0 : memref<1x1024xf32, #tpu.memory_space<any>>) target(%1 : memref<1x1024xf32, #tpu.memory_space<any>>) target_semaphore(%3 : memref<!tpu.dma_semaphore, #tpu.memory_space<semaphore_mem>>)
    %c1_i32 = arith.constant 1 : i32
    %c1_i32_4 = arith.constant 1 : i32
    %c0_i32_5 = arith.constant 0 : i32
    %4 = tpu.memref_slice %arg0[%c1_i32_4, %c0_i32_5] : memref<2x1024xf32, #tpu.memory_space<any>> -> memref<1x1024xf32, #tpu.memory_space<any>>
    %c1_i32_6 = arith.constant 1 : i32
    %c0_i32_7 = arith.constant 0 : i32
    %5 = tpu.memref_slice %arg1[%c1_i32_6, %c0_i32_7] : memref<2x1024xf32, #tpu.memory_space<any>> -> memref<1x1024xf32, #tpu.memory_space<any>>
    %6 = tpu.memref_slice %arg2[%c1_i32] : memref<2x!tpu.dma_semaphore, #tpu.memory_space<semaphore_mem>> -> memref<1x!tpu.dma_semaphore, #tpu.memory_space<semaphore_mem>>
    %7 = tpu.memref_squeeze %6 : memref<1x!tpu.dma_semaphore, #tpu.memory_space<semaphore_mem>> -> memref<!tpu.dma_semaphore, #tpu.memory_space<semaphore_mem>>
    tpu.enqueue_dma source(%4 : memref<1x1024xf32, #tpu.memory_space<any>>) target(%5 : memref<1x1024xf32, #tpu.memory_space<any>>) target_semaphore(%7 : memref<!tpu.dma_semaphore, #tpu.memory_space<semaphore_mem>>)
    %c0_i32_8 = arith.constant 0 : i32
    %c0_i32_9 = arith.constant 0 : i32
    %c0_i32_10 = arith.constant 0 : i32
    %8 = tpu.memref_slice %arg0[%c0_i32_9, %c0_i32_10] : memref<2x1024xf32, #tpu.memory_space<any>> -> memref<1x1024xf32, #tpu.memory_space<any>>
    %c0_i32_11 = arith.constant 0 : i32
    %c0_i32_12 = arith.constant 0 : i32
    %9 = tpu.memref_slice %arg1[%c0_i32_11, %c0_i32_12] : memref<2x1024xf32, #tpu.memory_space<any>> -> memref<1x1024xf32, #tpu.memory_space<any>>
    %10 = tpu.memref_slice %arg2[%c0_i32_8] : memref<2x!tpu.dma_semaphore, #tpu.memory_space<semaphore_mem>> -> memref<1x!tpu.dma_semaphore, #tpu.memory_space<semaphore_mem>>
    %11 = tpu.memref_squeeze %10 : memref<1x!tpu.dma_semaphore, #tpu.memory_space<semaphore_mem>> -> memref<!tpu.dma_semaphore, #tpu.memory_space<semaphore_mem>>
    tpu.wait_dma2 semaphore(%11 : memref<!tpu.dma_semaphore, #tpu.memory_space<semaphore_mem>>) src(%8 : memref<1x1024xf32, #tpu.memory_space<any>>) dst(%9 : memref<1x1024xf32, #tpu.memory_space<any>>)
    %c1_i32_13 = arith.constant 1 : i32
    %c1_i32_14 = arith.constant 1 : i32
    %c0_i32_15 = arith.constant 0 : i32
    %12 = tpu.memref_slice %arg0[%c1_i32_14, %c0_i32_15] : memref<2x1024xf32, #tpu.memory_space<any>> -> memref<1x1024xf32, #tpu.memory_space<any>>
    %c1_i32_16 = arith.constant 1 : i32
    %c0_i32_17 = arith.constant 0 : i32
    %13 = tpu.memref_slice %arg1[%c1_i32_16, %c0_i32_17] : memref<2x1024xf32, #tpu.memory_space<any>> -> memref<1x1024xf32, #tpu.memory_space<any>>
    %14 = tpu.memref_slice %arg2[%c1_i32_13] : memref<2x!tpu.dma_semaphore, #tpu.memory_space<semaphore_mem>> -> memref<1x!tpu.dma_semaphore, #tpu.memory_space<semaphore_mem>>
    %15 = tpu.memref_squeeze %14 : memref<1x!tpu.dma_semaphore, #tpu.memory_space<semaphore_mem>> -> memref<!tpu.dma_semaphore, #tpu.memory_space<semaphore_mem>>
    tpu.wait_dma2 semaphore(%15 : memref<!tpu.dma_semaphore, #tpu.memory_space<semaphore_mem>>) src(%12 : memref<1x1024xf32, #tpu.memory_space<any>>) dst(%13 : memref<1x1024xf32, #tpu.memory_space<any>>)
    return
  }
}

</mosaic_0001>

<bundles_post_ra>
// kernel: view_flatten_materialized.1
= control target key start
LH: loop header
LB: loop body
LE: loop exit
PB: predicated region body
PF: predicated region fallthrough
CT: control target
= control target key end

     0   :  { %s112_s0 = inlined_call_operand.vmem [shape: f32[2,1024], index: 0, kind: input, shape index: {}]   ;;  %s113_s1 = inlined_call_operand.hbm [shape: f32[2,1024], index: 1, kind: output, shape index: {}]  }
   0x1   :  { %s7_s8 = sshll.u32 %s112_s0, 4  ;;  %s11_s11 = scalar_lea.vmem %s112_s0, 1  ;;  %s8_s8 = int_to_ptr.vmem [resolvable:$true] %s7_s8 }
   0x2   :  { %s12_s14 = scalar_lea.hbm %s113_s1, 16  ;;  %s41_s15 = scalar_lea.vmem %s8_s8, 128 }
   0x3   :  { %p42_p0 = scmp.ne.s32.totalorder %s8_s8, %s41_s15  ;;  %s45_s16 = scalar_lea.vmem %s8_s8, 256 }
   0x4   :  { %p46_p1 = scmp.lt.s32.totalorder %s8_s8, %s8_s8  ;;  %p47_p2 = scmp.lt.s32.totalorder %s45_s16, %s41_s15 }
   0x6   :  { %p48_p3 = por %p47_p2, %p46_p1 }
   0x8   :  { %p49_p4 = pnand %p48_p3, %p42_p0 }
   0xa   :  { %52 = shalt.err (!%p49_p4)  }
   0xb   :  { %s88_s17 = smov 32   ;;  %s89_s18 = smov 1  }
   0xc   :  { %10 = dma.vmem_to_hbm [thread:$0]  %s8_s8, 128, %s113_s1, [#allocation2], %s88_s17, %s88_s17, %s89_s18 }
   0xd   :  { %s15_s0 = sshll.u32 %s11_s11, 4  ;;  %s16_s0 = int_to_ptr.vmem [resolvable:$true] %s15_s0 }
   0xe   :  { %s61_s21 = scalar_lea.vmem %s16_s0, 128  ;;  %p66_p6 = scmp.lt.s32.totalorder %s16_s0, %s8_s8 }
   0xf   :  { %p62_p5 = scmp.ne.s32.totalorder %s16_s0, %s61_s21  ;;  %p67_p7 = scmp.lt.s32.totalorder %s45_s16, %s61_s21 }
  0x11   :  { %p68_p8 = por %p67_p7, %p66_p6 }
  0x13   :  { %p69_p9 = pnand %p68_p8, %p62_p5 }
  0x15   :  { %72 = shalt.err (!%p69_p9)  }
  0x16   :  { %18 = dma.vmem_to_hbm [thread:$0]  %s16_s0, 128, %s12_s14, [#allocation2 + $0x1], %s88_s17, %s88_s17, %s89_s18 }
  0x17   :  { %84 = dma.done.wait [#allocation2], 128 }
  0x18   :  { %85 = vsyncadd [#allocation2], 4294967168 }
  0x19   :  { %86 = dma.done.wait [#allocation2 + $0x1], 128 }
  0x1a   :  { %87 = vsyncadd [#allocation2 + $0x1], 4294967168 }
  0x1b   :  { %24 = vsyncmov [#allocation2] }
  0x1e   :  { %s25_s22 = vpop.sfrf %24 }
  0x1f   :  { %p37_p10 = scmp.ne.s32.totalorder %s25_s22, 0 }
  0x21   :  { %29 = shalt.err (%p37_p10)  }
  0x22   :  { %31 = vsyncmov [#allocation2 + $0x1] }
  0x25   :  { %s32_s1 = vpop.sfrf %31 }
  0x26   :  { %p38_p11 = scmp.ne.s32.totalorder %s32_s1, 0 }
  0x28   :  { %36 = shalt.err (%p38_p11)  }

</bundles_post_ra>
